<compile_context>
chip_gen: v7x
topology: tpu7x:2x2x1
jax: 0.10.0
libtpu: 0.0.40
codegen_flags: <defaults>
</compile_context>

<pallas_src>
import functools

import jax
import jax.numpy as jnp
from jax import lax
from jax.experimental import pallas as pl
from jax.experimental.pallas import tpu as pltpu

IGNORE_INDEX = 255
_LANE = 128
_LOGITS_BLOCK_BYTES = 2 * 1024 * 1024   # ~2 MiB of f32 logits per grid step


def _focal_ce_partial_kernel(logits_ref, tgt_ref, sum_ref, cnt_ref, *, hw, t_hw):
    """Per-(n, pixel-tile) partial masked-CE sum and valid-pixel count.

    logits_ref: (C, T_HW)  channels in sublanes, pixels lane-dense
    tgt_ref:    (1, T_HW)  int32 targets
    sum_ref, cnt_ref: (1, 1, 1, 1) f32 partials for this grid cell
    """
    j = pl.program_id(1)

    logits = logits_ref[...].astype(jnp.float32)          # (C, T)
    tgt = tgt_ref[...]                                     # (1, T)

    # Numerically stable per-pixel log-sum-exp over the channel (sublane) axis.
    m = jnp.max(logits, axis=0, keepdims=True)                             # (1, T)
    lse = m + jnp.log(jnp.sum(jnp.exp(logits - m), axis=0, keepdims=True))  # (1, T)

    # logits[target[p], p] via a one-hot select over channels.
    ch = lax.broadcasted_iota(jnp.int32, logits.shape, 0)                  # (C, T)
    picked = jnp.sum(jnp.where(ch == tgt, logits, 0.0), axis=0, keepdims=True)

    ce = lse - picked                                                      # (1, T)

    # Valid = not ignore_index AND inside the (possibly ragged) pixel range.
    pix = j * t_hw + lax.broadcasted_iota(jnp.int32, tgt.shape, 1)         # (1, T)
    valid = (tgt != IGNORE_INDEX) & (pix < hw)

    # Mask with where (not multiply) so stale/garbage lanes in a ragged tail
    # block cannot inject inf/nan into the partial sums.
    sum_ref[...] = jnp.sum(jnp.where(valid, ce, 0.0)).reshape(1, 1, 1, 1)
    cnt_ref[...] = jnp.sum(valid.astype(jnp.float32)).reshape(1, 1, 1, 1)


def _pixel_tile(hw, c):
    """Lane-dense pixel tile (~2 MiB of f32 logits), capped at the full extent."""
    budget = _LOGITS_BLOCK_BYTES // max(1, c * 4)
    t = (budget // _LANE) * _LANE
    if t <= 0 or t >= hw:
        return hw          # full-extent last dim is always a legal block dim
    return t               # multiple of 128; ragged tail masked in-kernel


@functools.partial(jax.jit, static_argnames=("alpha", "gamma", "size_average"))
def focal_loss_2d(output, target, *, alpha=0.5, gamma=2, size_average=True):
    """output: (N, C, H, W) float; target: (N, H, W) int."""
    N, C, H, W = output.shape
    HW = H * W

    # View-only reshapes: keep the native NCHW element order (no transpose/pad).
    logits = output.reshape(N, C, HW)
    tgt = target.reshape(N, 1, HW).astype(jnp.int32)

    T_HW = _pixel_tile(HW, C)
    num_j = pl.cdiv(HW, T_HW)

    kernel = functools.partial(_focal_ce_partial_kernel, hw=HW, t_hw=T_HW)

    part_sum, part_cnt = pl.pallas_call(
        kernel,
        out_shape=(
            jax.ShapeDtypeStruct((N, num_j, 1, 1), jnp.float32),
            jax.ShapeDtypeStruct((N, num_j, 1, 1), jnp.float32),
        ),
        grid_spec=pltpu.PrefetchScalarGridSpec(
            num_scalar_prefetch=0,
            grid=(N, num_j),
            in_specs=[
                pl.BlockSpec((pl.Squeezed(), C, T_HW), lambda n, j: (n, 0, j)),
                pl.BlockSpec((pl.Squeezed(), 1, T_HW), lambda n, j: (n, 0, j)),
            ],
            out_specs=[
                pl.BlockSpec((1, 1, 1, 1), lambda n, j: (n, j, 0, 0)),
                pl.BlockSpec((1, 1, 1, 1), lambda n, j: (n, j, 0, 0)),
            ],
        ),
        compiler_params=pltpu.CompilerParams(
            dimension_semantics=("parallel", "parallel"),
            vmem_limit_bytes=32 * 1024 * 1024,
        ),
    )(logits, tgt)

    # Tiny final reduce + focal transform in plain JAX.
    logpt = jnp.sum(part_sum) / jnp.sum(part_cnt)
    pt = jnp.exp(-logpt)
    loss = (1.0 - pt) ** gamma * alpha * logpt
    return loss  # scalar; .mean()/.sum() are identity here


def _reference_focal_loss(output, target, alpha=0.5, gamma=2):
    N, C, H, W = output.shape
    logits = jnp.transpose(output.reshape(N, C, H * W), (0, 2, 1)).reshape(-1, C)
    logits = logits.astype(jnp.float32)
    tgt = target.reshape(-1).astype(jnp.int32)
    lse = jax.scipy.special.logsumexp(logits, axis=-1)
    picked = jnp.take_along_axis(
        logits, jnp.clip(tgt, 0, C - 1)[:, None], axis=-1
    )[:, 0]
    ce = lse - picked
    valid = (tgt != IGNORE_INDEX).astype(jnp.float32)
    logpt = jnp.sum(ce * valid) / jnp.sum(valid)
    pt = jnp.exp(-logpt)
    return (1.0 - pt) ** gamma * alpha * logpt


if __name__ == "__main__":
    key = jax.random.PRNGKey(0)
    k1, k2 = jax.random.split(key)

    N, C, H, W = 2, 4, 16, 16
    output = jax.random.normal(k1, (N, C, H, W), dtype=jnp.float32)
    target = jax.random.randint(k2, (N, H, W), 0, C, dtype=jnp.int32)
    # Mark a few pixels as ignore_index to exercise masking.
    target = target.at[0, 0, :4].set(IGNORE_INDEX)

    loss = focal_loss_2d(output, target, alpha=0.5, gamma=2, size_average=True)
    loss = jax.block_until_ready(loss)

    ref = _reference_focal_loss(output, target)
    assert jnp.allclose(loss, ref, rtol=1e-5, atol=1e-6), (loss, ref)

    print("KERNEL_OK")
</pallas_src>

<mosaic_0001>
module attributes {stable_mosaic.version = 11 : i64} {
  func.func @_focal_ce_partial_kernel(%arg0: i32, %arg1: i32, %arg2: memref<1x4x256xf32, #tpu.memory_space<vmem>>, %arg3: memref<1x1x256xi32, #tpu.memory_space<vmem>>, %arg4: memref<1x1x1x1xf32, #tpu.memory_space<vmem>>, %arg5: memref<1x1x1x1xf32, #tpu.memory_space<vmem>>) attributes {dimension_semantics = [#tpu.dimension_semantics<parallel>, #tpu.dimension_semantics<parallel>], iteration_bounds = array<i64: 2, 1>, scalar_prefetch = 0 : i64, scratch_operands = 0 : i64, tpu.core_type = #tpu.core_type<tc>, window_params = [{transform_indices = @transform_0, window_bounds = array<i64: 1, 4, 256>}, {transform_indices = @transform_1, window_bounds = array<i64: 1, 1, 256>}, {transform_indices = @transform_2, window_bounds = array<i64: 1, 1, 1, 1>}, {transform_indices = @transform_3, window_bounds = array<i64: 1, 1, 1, 1>}]} {
    %c0 = arith.constant 0 : index
    %c0_0 = arith.constant 0 : index
    %c0_1 = arith.constant 0 : index
    %0 = vector.load %arg2[%c0, %c0_0, %c0_1] : memref<1x4x256xf32, #tpu.memory_space<vmem>>, vector<1x4x256xf32>
    %1 = vector.shape_cast %0 : vector<1x4x256xf32> to vector<4x256xf32>
    %c0_2 = arith.constant 0 : index
    %c0_3 = arith.constant 0 : index
    %c0_4 = arith.constant 0 : index
    %2 = vector.load %arg3[%c0_2, %c0_3, %c0_4] : memref<1x1x256xi32, #tpu.memory_space<vmem>>, vector<1x1x256xi32>
    %3 = vector.shape_cast %2 : vector<1x1x256xi32> to vector<1x256xi32>
    %cst = arith.constant dense<0xFF800000> : vector<256xf32>
    %4 = vector.multi_reduction <maximumf>, %1, %cst [0] : vector<4x256xf32> to vector<256xf32>
    %5 = vector.shape_cast %4 : vector<256xf32> to vector<1x256xf32>
    %6 = vector.broadcast %5 : vector<1x256xf32> to vector<4x256xf32>
    %7 = arith.subf %1, %6 : vector<4x256xf32>
    %8 = math.exp %7 : vector<4x256xf32>
    %cst_5 = arith.constant dense<0.000000e+00> : vector<256xf32>
    %9 = vector.multi_reduction <add>, %8, %cst_5 [0] : vector<4x256xf32> to vector<256xf32>
    %10 = vector.shape_cast %9 : vector<256xf32> to vector<1x256xf32>
    %11 = math.log %10 : vector<1x256xf32>
    %12 = arith.addf %5, %11 : vector<1x256xf32>
    %13 = tpu.iota {dimensions = array<i32: 0>} : vector<4x256xi32>
    %14 = vector.broadcast %3 : vector<1x256xi32> to vector<4x256xi32>
    %15 = arith.cmpi eq, %13, %14 : vector<4x256xi32>
    %cst_6 = arith.constant 0.000000e+00 : f32
    %16 = vector.broadcast %cst_6 : f32 to vector<4x256xf32>
    %17 = arith.select %15, %1, %16 : vector<4x256xi1>, vector<4x256xf32>
    %cst_7 = arith.constant dense<0.000000e+00> : vector<256xf32>
    %18 = vector.multi_reduction <add>, %17, %cst_7 [0] : vector<4x256xf32> to vector<256xf32>
    %19 = vector.shape_cast %18 : vector<256xf32> to vector<1x256xf32>
    %20 = arith.subf %12, %19 : vector<1x256xf32>
    %c256_i32 = arith.constant 256 : i32
    %21 = arith.muli %arg1, %c256_i32 : i32
    %22 = tpu.iota {dimensions = array<i32: 1>} : vector<1x256xi32>
    %23 = vector.broadcast %21 : i32 to vector<1x256xi32>
    %24 = arith.addi %23, %22 : vector<1x256xi32>
    %c255_i32 = arith.constant 255 : i32
    %25 = vector.broadcast %c255_i32 : i32 to vector<1x256xi32>
    %26 = arith.cmpi ne, %3, %25 : vector<1x256xi32>
    %c256_i32_8 = arith.constant 256 : i32
    %27 = vector.broadcast %c256_i32_8 : i32 to vector<1x256xi32>
    %28 = arith.cmpi slt, %24, %27 : vector<1x256xi32>
    %29 = arith.andi %26, %28 : vector<1x256xi1>
    %cst_9 = arith.constant 0.000000e+00 : f32
    %30 = vector.broadcast %cst_9 : f32 to vector<1x256xf32>
    %31 = arith.select %29, %20, %30 : vector<1x256xi1>, vector<1x256xf32>
    %32 = vector.shape_cast %31 : vector<1x256xf32> to vector<1x1x256xf32>
    %cst_10 = arith.constant dense<0.000000e+00> : vector<1xf32>
    %33 = vector.multi_reduction <add>, %32, %cst_10 [1, 2] : vector<1x1x256xf32> to vector<1xf32>
    %34 = vector.shape_cast %33 : vector<1xf32> to vector<1x1x1xf32>
    %35 = vector.extract %34[0, 0, 0] : f32 from vector<1x1x1xf32>
    %36 = vector.broadcast %35 : f32 to vector<1x1x1x1xf32>
    %c0_11 = arith.constant 0 : index
    %c0_12 = arith.constant 0 : index
    %c0_13 = arith.constant 0 : index
    %c0_14 = arith.constant 0 : index
    %37 = vector.load %arg4[%c0_11, %c0_12, %c0_13, %c0_14] : memref<1x1x1x1xf32, #tpu.memory_space<vmem>>, vector<1x1x1x1xf32>
    tpu.vector_store %arg4[%c0_11, %c0_12, %c0_13, %c0_14], %36 {strides = array<i32>} : memref<1x1x1x1xf32, #tpu.memory_space<vmem>>, vector<1x1x1x1xf32>,
    %38 = arith.extui %29 : vector<1x256xi1> to vector<1x256xi32>
    %39 = arith.sitofp %38 : vector<1x256xi32> to vector<1x256xf32>
    %40 = vector.shape_cast %39 : vector<1x256xf32> to vector<1x1x256xf32>
    %cst_15 = arith.constant dense<0.000000e+00> : vector<1xf32>
    %41 = vector.multi_reduction <add>, %40, %cst_15 [1, 2] : vector<1x1x256xf32> to vector<1xf32>
    %42 = vector.shape_cast %41 : vector<1xf32> to vector<1x1x1xf32>
    %43 = vector.extract %42[0, 0, 0] : f32 from vector<1x1x1xf32>
    %44 = vector.broadcast %43 : f32 to vector<1x1x1x1xf32>
    %c0_16 = arith.constant 0 : index
    %c0_17 = arith.constant 0 : index
    %c0_18 = arith.constant 0 : index
    %c0_19 = arith.constant 0 : index
    %45 = vector.load %arg5[%c0_16, %c0_17, %c0_18, %c0_19] : memref<1x1x1x1xf32, #tpu.memory_space<vmem>>, vector<1x1x1x1xf32>
    tpu.vector_store %arg5[%c0_16, %c0_17, %c0_18, %c0_19], %44 {strides = array<i32>} : memref<1x1x1x1xf32, #tpu.memory_space<vmem>>, vector<1x1x1x1xf32>,
    return
  }
  func.func @transform_0(%arg0: i32, %arg1: i32) -> (i32, i32, i32) {
    %c0_i32 = arith.constant 0 : i32
    %c0_i32_0 = arith.constant 0 : i32
    return %arg0, %c0_i32, %arg1 : i32, i32, i32
  }
  func.func @transform_1(%arg0: i32, %arg1: i32) -> (i32, i32, i32) {
    %c0_i32 = arith.constant 0 : i32
    %c0_i32_0 = arith.constant 0 : i32
    return %arg0, %c0_i32, %arg1 : i32, i32, i32
  }
  func.func @transform_2(%arg0: i32, %arg1: i32) -> (i32, i32, i32, i32) {
    %c0_i32 = arith.constant 0 : i32
    %c0_i32_0 = arith.constant 0 : i32
    %c0_i32_1 = arith.constant 0 : i32
    return %arg0, %arg1, %c0_i32, %c0_i32_0 : i32, i32, i32, i32
  }
  func.func @transform_3(%arg0: i32, %arg1: i32) -> (i32, i32, i32, i32) {
    %c0_i32 = arith.constant 0 : i32
    %c0_i32_0 = arith.constant 0 : i32
    %c0_i32_1 = arith.constant 0 : i32
    return %arg0, %arg1, %c0_i32, %c0_i32_0 : i32, i32, i32, i32
  }
}

</mosaic_0001>

<bundles_post_ra>
// kernel: focal_loss_2d.1
= control target key start
LH: loop header
LB: loop body
LE: loop exit
PB: predicated region body
PF: predicated region fallthrough
CT: control target
= control target key end

     0   :  { %s653_s12 = smov 0   ;;  %s655_s13 = smov 0   ;;  %s714_s0 = inlined_call_operand.vmem [shape: f32[2,4,256], index: 0, kind: input, shape index: {}]   ;;  %s715_s1 = inlined_call_operand.vmem [shape: s32[2,1,256], index: 1, kind: input, shape index: {}]   ;;  %s716_s2 = inlined_call_operand.vmem [shape: f32[2,1,1,1], index: 2, kind: output, shape index: {0}]   ;;  %s717_s3 = inlined_call_operand.vmem [shape: f32[2,1,1,1], index: 3, kind: output, shape index: {1}]  }
   0x1   :  { %s657_s14 = smov 0  }
   0x2 LB: > { %s26_s15 = sadd.s32 1, %s624_s13  ;;  %p560_p0 = scmp.ge.s32.totalorder %s628_s14, 1  ;;  %s628_s14 = sphi %s657_s14, %s14_s14   ;;  %s624_s13 = sphi %s655_s13, %s719_s13   ;;  %s620_s12 = sphi %s653_s12, %s718_s12  }
   0x3   : > { %p28_p1 = scmp.ge.s32.totalorder %s26_s15, 2  ;;  %p179_p2 = scmp.lt.s32.totalorder %s628_s14, 3 }
   0x5   : > { %s721_s15 = smov (%p28_p1, %s26_s15), 0  ;;  %p180_p3 = pnand %p560_p0, %p179_p2 }
   0x6   : > { %p223_p4 = scmp.lt.s32.totalorder (!%p180_p3), %s620_s12, 1  ;;  %vm258_vm0 = vcmask (!%p180_p3), 1043456   ;;  %v303_v15 = vlaneseq (!%p180_p3)  ;;  %v630_v47 = vmov (!%p180_p3), 1966171168   ;;  %v631_v57 = vmov (!%p180_p3), 1  }
   0x7   : > { %183 = sbr.rel (%p180_p3) target bundleno = 304 (0x130), region = 28  ;;  %v347_v48 = vunpack.c.l.s4 (!%p180_p3), %v630_v47  ;;  %v345_v58 = vcombine.low (!%p180_p3), %v631_v57, %v631_v57  ;;  %vm392_vm6 = vcmask (!%p180_p3), 1040384   ;;  %vm406_vm7 = vcmask (!%p180_p3), 0  }
   0x8   : > { %v304_v18 = vshrl.u32 (!%p180_p3), %v303_v15, 7 }
   0x9   : > { %v348_v54 = vunpack.c.0.s8 (!%p180_p3), %v347_v48 }
   0xa   : > { %v683_v21 = vsub.s32 (!%p180_p3), 0, %v304_v18  ;;  %v685_v23 = vsub.s32 (!%p180_p3), 1, %v304_v18 }
   0xb   : > { %v351_v59 = vsub.s32 (!%p180_p3), %v348_v54, %v304_v18 }
   0xd   : > { %v352_v62 = vrot.slane (!%p180_p3), %v345_v58, %v351_v59 }
   0xe   : > { %s723_s12 = smov (!%p223_p4, %s620_s12), 1 }
   0xf   : > { %s567_s16 = sshll.u32 %s723_s12, 3  ;;  %s563_s20 = sshll.u32 %s723_s12, 1 }
  0x10   : > { %s230_s19 = scalar_lea.vmem %s714_s0, %s567_s16  ;;  %s239_s23 = scalar_lea.vmem %s715_s1, %s563_s20 }
  0x11   : > { %v253_v0 = vld [vmem:[%s230_s19] sm:$0xff]  ;;  %s246_s26 = scalar_lea.vmem %s716_s2, %s723_s12  ;;  %s252_s30 = scalar_lea.vmem %s717_s3, %s723_s12 }
  0x12   : > { %v256_v1 = vcombine.high %v253_v0, %v253_v0  ;;  %v259_v2 = vsel %vm258_vm0, %v253_v0, -inf  ;;  %v254_v22 = vld [vmem:[%s239_s23] sm:$0x3] }
  0x13   : > { %v260_v3 = vrot.slane %v259_v2, 4  ;;  %v308_v24 = vrot.slane %v254_v22, %v683_v21  ;;  %v312_v25 = vrot.slane %v254_v22, %v685_v23  ;;  %vm340_vm3 = vcmp.ne.s32.totalorder %v254_v22, 255 }
  0x14   : > { %v266_v4 = vsel %vm258_vm0, %v256_v1, -inf }
  0x15   : > { %v261_v5 = vmax.f32 %v259_v2, %v260_v3  ;;  %v267_v6 = vrot.slane %v266_v4, 4  ;;  %vm313_vm1 = vcmp.eq.s32.totalorder %v304_v18, %v308_v24  ;;  %vm314_vm2 = vcmp.eq.s32.totalorder %v304_v18, %v312_v25 }
  0x16   : > { %v315_v26 = vsel %vm313_vm1, %v253_v0, 0.0  ;;  %v316_v30 = vsel %vm314_vm2, %v256_v1, 0.0 }
  0x17   : > { %v262_v7 = vrot.slane %v261_v5, 2  ;;  %v268_v8 = vmax.f32 %v266_v4, %v267_v6  ;;  %v317_v32 = vsel %vm258_vm0, %v315_v26, 0.0  ;;  %v324_v36 = vsel %vm258_vm0, %v316_v30, 0.0 }
  0x18   : > { %v318_v37 = vrot.slane %v317_v32, 4  ;;  %v325_v40 = vrot.slane %v324_v36, 4  ;;  %v359_v6 = vrot.slane %v352_v62, %v351_v59 }
  0x19   : > { %v263_v9 = vmax.f32 %v261_v5, %v262_v7  ;;  %v269_v10 = vrot.slane %v268_v8, 2 }
  0x1a   : > { %v319_v43 = vadd.f32 %v318_v37, %v317_v32  ;;  %v326_v46 = vadd.f32 %v325_v40, %v324_v36  ;;  %vm360_vm4 = vcmp.ne.s32.totalorder %v359_v6, 0 }
  0x1b   : > { %v264_v11 = vrot.slane %v263_v9, 1  ;;  %v270_v12 = vmax.f32 %v268_v8, %v269_v10  ;;  %vm361_vm5 = vmand %vm340_vm3, %vm360_vm4 }
  0x1c   : > { %v320_v51 = vrot.slane %v319_v43, 2  ;;  %v327_v53 = vrot.slane %v326_v46, 2 }
  0x1d   : > { %v265_v13 = vmax.f32 %v263_v9, %v264_v11  ;;  %v271_v14 = vrot.slane %v270_v12, 1 }
  0x1e   : > { %v321_v55 = vadd.f32 %v320_v51, %v319_v43  ;;  %v328_v56 = vadd.f32 %v327_v53, %v326_v46 }
  0x1f   : > { %v272_v16 = vmax.f32 %v270_v12, %v271_v14  ;;  %v632_v12 = vmov 0.0  }
  0x20   : > { %v322_v60 = vrot.slane %v321_v55, 1  ;;  %v329_v61 = vrot.slane %v328_v56, 1  ;;  %v564_v14 = vsel %vm361_vm5, 1.0, %v632_v12 }
  0x21   : > { %v275_v17 = vcombine.low %v265_v13, %v272_v16  ;;  %v418_v18 = vrot.slane %v564_v14, %v685_v23 }
  0x22   : > { %v323_v1 = vadd.f32 %v322_v60, %v321_v55  ;;  %v330_v5 = vadd.f32 %v329_v61, %v328_v56 }
  0x23   : > { %v277_v19 = vsub.f32 %v253_v0, %v275_v17  ;;  %v414_v17 = vrot.slane %v564_v14, %v683_v21  ;;  %v422_v25 = vsel %vm392_vm6, %v418_v18, 0.0 }
  0x25   : > { %v278_v20 = vmul.f32 1.442695, %v277_v19  ;;  %v421_v22 = vsel %vm392_vm6, %v414_v17, 0.0 }
  0x27   : > { %600 = vpow2.f32 %v278_v20 }
  0x31   : > { %v601_v27 = vpop.eup %600 }
  0x32   : > { %v281_v28 = vcombine.high %v601_v27, %v601_v27  ;;  %v283_v29 = vsel %vm258_vm0, %v601_v27, 0.0  ;;  %v423_v27 = vadd.f32 %v422_v25, %v421_v22 }
  0x33   : > { %v284_v31 = vrot.slane %v283_v29, 4 }
  0x34   : > { %v290_v33 = vsel %vm258_vm0, %v281_v28, 0.0 }
  0x35   : > { %v285_v34 = vadd.f32 %v284_v31, %v283_v29  ;;  %v291_v35 = vrot.slane %v290_v33, 4 }
  0x37   : > { %v286_v38 = vrot.slane %v285_v34, 2  ;;  %v292_v39 = vadd.f32 %v291_v35, %v290_v33 }
  0x39   : > { %v287_v41 = vadd.f32 %v286_v38, %v285_v34  ;;  %v293_v42 = vrot.slane %v292_v39, 2 }
  0x3b   : > { %v288_v44 = vrot.slane %v287_v41, 1  ;;  %v294_v45 = vadd.f32 %v293_v42, %v292_v39 }
  0x3d   : > { %v289_v49 = vadd.f32 %v288_v44, %v287_v41  ;;  %v295_v50 = vrot.slane %v294_v45, 1 }
  0x3f   : > { %v296_v52 = vadd.f32 %v295_v50, %v294_v45  ;;  %602 = vlog2.f32 %v289_v49 }
  0x41   : > { %604 = vlog2.f32 %v296_v52 }
  0x49   : > { %v603_v63 = vpop.eup %602 }
  0x4a   : > { %v298_v0 = vmul.f32 0.6931472, %v603_v63 }
  0x4b   : > { %v605_v2 = vpop.eup %604 }
  0x4c   : > { %v300_v3 = vmul.f32 0.6931472, %v605_v2  ;;  %v301_v4 = vadd.f32 %v298_v0, %v265_v13 }
  0x4e   : > { %v302_v7 = vadd.f32 %v300_v3, %v272_v16  ;;  %v331_v8 = vsub.f32 %v301_v4, %v323_v1 }
  0x50   : > { %v332_v9 = vsub.f32 %v302_v7, %v330_v5 }
  0x52   : > { %v364_v10 = vcombine.low %v331_v8, %v332_v9 }
  0x54   : > { %v371_v11 = vrot.slane %v364_v10, %v351_v59 }
  0x56   : > { %v378_v15 = vrot.slane %v371_v11, %v351_v59 }
  0x58   : > { %v380_v19 = vsel %vm361_vm5, %v378_v15, 0.0 }
  0x59   : > { %v385_v13 = vrot.slane %v380_v19, %v683_v21  ;;  %v389_v16 = vrot.slane %v380_v19, %v685_v23 }
  0x5b   : > { %v393_v20 = vsel %vm392_vm6, %v385_v13, 0.0  ;;  %v394_v24 = vsel %vm392_vm6, %v389_v16, 0.0 }
  0x5c   : > { %v395_v26 = vadd.f32 %v394_v24, %v393_v20 }
  0x5e   : > { %396 = vadd.xlane.f32.xlu0 %v395_v26 }
  0x62   : > { %424 = vadd.xlane.f32.xlu0 %v423_v27 }
  0xeb   : > { %v397_v28 = vpop.xlane.xlu0 %396 }
  0xec   : > { %v398_v29 = vrot.slane %v397_v28, 4 }
  0xee   : > { %v399_v30 = vadd.f32 %v398_v29, %v397_v28 }
  0xef   : > { %v425_v31 = vpop.xlane.xlu0 %424 }
  0xf0   : > { %v400_v32 = vrot.slane %v399_v30, 2  ;;  %v426_v33 = vrot.slane %v425_v31, 4 }
  0xf2   : > { %v427_v34 = vadd.f32 %v426_v33, %v425_v31  ;;  %v401_v21 = vadd.f32 %v400_v32, %v399_v30 }
  0xf4   : > { %v428_v35 = vrot.slane %v427_v34, 2  ;;  %v402_v23 = vrot.slane %v401_v21, 1 }
  0xf6   : > { %v429_v36 = vadd.f32 %v428_v35, %v427_v34  ;;  %v403_v37 = vadd.f32 %v402_v23, %v401_v21 }
  0xf8   : > { %568 = vpush %v403_v37  ;;  %v430_v38 = vrot.slane %v429_v36, 1 }
  0xfa   : > { %v431_v39 = vadd.f32 %v430_v38, %v429_v36 }
  0xfc   : > { %570 = vpush %v431_v39 }
 0x129   : > { %s569_s27 = spop %568 }
 0x12a   : > { %v405_v40 = vstv %s569_s27 }
 0x12b   : > { %407 = vst.msk [vmem:[%s246_s26] sm:$0x1] %vm406_vm7, %v405_v40 }
 0x12d   : > { %s571_s4 = spop %570 }
 0x12e   : > { %v433_v41 = vstv %s571_s4 }
 0x12f   : > { %434 = vst.msk [vmem:[%s252_s30] sm:$0x1] %vm406_vm7, %v433_v41 }
 0x130 PF: > { %s14_s14 = sadd.s32 1, %s628_s14   ;;  %s718_s12 = smov %s624_s13 }
 0x131   : > { %p11_p5 = scmp.ge.s32.totalorder %s14_s14, 4   ;;  %s719_s13 = smov %s721_s15 }
 0x133   :  { %13 = sbr.rel (!%p11_p5) target bundleno = 2 (0x2), region = 73 }

</bundles_post_ra>
